<compile_context>
chip_gen: v7x
topology: tpu7x:2x2x1
jax: 0.10.0
libtpu: 0.0.40
codegen_flags: <defaults>
</compile_context>

<pallas_src>
import jax
import jax.numpy as jnp
from jax.experimental import pallas as pl
from jax.experimental.pallas import tpu as pltpu


# ----------------------------------------------------------------------------
# Kernel
# ----------------------------------------------------------------------------
def _sr_kernel(xcol_ref, w1_ref, w2_ref, g_ref, bt_ref, o_ref):
    w1 = w1_ref[...]                 # (C_ext, K_pad)   conv1 weights, b1 + passthrough rows folded
    w2 = w2_ref[...]                 # (C_mid, C_ext)   1x1 conv weights, b2 column folded
    g = g_ref[...]                   # (C_mid, HW)      LayerNorm gamma (kernel layout), f32
    bt = bt_ref[...]                 # (C_mid, HW)      LayerNorm beta  (kernel layout), f32
    xc = xcol_ref[...]               # (K_pad, nb*HW)   im2col columns (+1 row, +zero pad rows)

    # conv1 (3x3, pad=1) + b1 for ALL samples of this grid step as ONE matmul.
    acc = jnp.dot(w1, xc, preferred_element_type=jnp.float32)      # (C_ext, nb*HW) f32
    acc = jnp.maximum(acc, 0.0)                                    # ReLU (passthrough row stays 1)

    # conv2 (1x1) + b2 (b2 enters via the constant-1 passthrough row of acc).
    y = jnp.dot(w2, acc.astype(w2.dtype),
                preferred_element_type=jnp.float32)                # (C_mid, nb*HW) f32

    hw = g_ref.shape[1]              # H*W (lane-tile aligned: multiple of 128 here)
    nb = xcol_ref.shape[1] // hw     # samples in this grid step (static, small)
    inv_n = 1.0 / float(g_ref.shape[0] * hw)   # 1 / (C_out * H_out * W_out)

    # Per-sample LayerNorm epilogue only (stats + affine).  Static lane slices:
    # lo is a multiple of 256 -> free vreg subsets, unmasked lane-dense stores.
    for i in range(nb):
        lo = i * hw
        yi = y[:, lo:lo + hw]                                      # (C_mid, HW)
        mean = jnp.sum(yi) * inv_n
        d = yi - mean
        var = jnp.sum(d * d) * inv_n                               # two-pass: no cancellation
        inv = jax.lax.rsqrt(var + 1e-5)
        o_ref[:, lo:lo + hw] = (d * inv * g + bt).astype(o_ref.dtype)


# ----------------------------------------------------------------------------
# Core-count detection (robust, never crashes; falls back to single-TC)
# ----------------------------------------------------------------------------
def _num_tensorcores():
    try:
        info = pltpu.get_tpu_info()
        for name in ("num_cores", "num_tensorcores", "tensorcore_count",
                     "num_cores_per_chip", "cores_per_chip"):
            v = getattr(info, name, None)
            if isinstance(v, int) and v > 0:
                return v
    except Exception:
        pass
    try:
        d = jax.devices()[0]
        for name in ("num_cores", "core_count", "num_cores_per_chip"):
            v = getattr(d, name, None)
            if isinstance(v, int) and v > 0:
                return v
    except Exception:
        pass
    return 1


def _samples_per_step(n_batch):
    """How many samples to lane-fold into one grid step."""
    cores = _num_tensorcores()
    if cores > 1 and n_batch % cores == 0:
        nb = n_batch // cores        # shard sample-chunks across TensorCores ("parallel")
    else:
        nb = n_batch                 # single-TC: grid is a serial loop -> one step only
    # Bound the per-step LN-epilogue unroll (vreg live-range pressure, esp. v5e).
    while nb > 8 and nb % 2 == 0:
        nb //= 2
    return nb


# ----------------------------------------------------------------------------
# Wrapper
# ----------------------------------------------------------------------------
def super_resoultor(x_nchw, params, mxu_dtype=jnp.float32):
    """x_nchw: (N, C_in, H, W) f32 -> (N, C_out, 2H, 2W) f32.

    mxu_dtype: dtype of the matmul operands (jnp.float32 keeps reference
    numerics; jnp.bfloat16 halves DMA/vreg bytes of the im2col tile, MXU-native
    on v5e/v6e/v7x, accumulation and LayerNorm stay f32).
    """
    w1, b1, w2, b2, gamma, beta = params        # w1: (3,3,C_in,C_mid) HWIO; w2: (in,out)
    N, C_in, H, W = x_nchw.shape
    C_mid = w2.shape[1]
    C_out = C_mid // 4
    HW = H * W
    NHW = N * HW
    K = 9 * C_in + 1                             # im2col depth + constant-1 (bias) row
    K_pad = ((K + 7) // 8) * 8                   # sublane-align the contraction dim (37 -> 40)
    C_ext = ((C_mid + 1 + 7) // 8) * 8           # conv1 out channels + passthrough row, aligned

    # ---- glue (jit-fused): im2col in spatial-on-lanes layout, batch on lanes --
    # Lane index of xcol = n*HW + h*W + w ; row index = (dy*3+dx)*C_in + c.
    xp = jnp.pad(x_nchw, ((0, 0), (0, 0), (1, 1), (1, 1)))          # (N, C_in, H+2, W+2)
    xp = jnp.transpose(xp, (1, 0, 2, 3))                            # (C_in, N, H+2, W+2)
    rows = [xp[:, :, dy:dy + H, dx:dx + W].reshape(C_in, NHW)
            for dy in range(3) for dx in range(3)]
    rows.append(jnp.ones((1, NHW), x_nchw.dtype))                   # constant-1 row (b1, b2 fold)
    rows.append(jnp.zeros((K_pad - K, NHW), x_nchw.dtype))          # zero pad rows (K -> K_pad)
    xcol = jnp.concatenate(rows, axis=0).astype(mxu_dtype)          # (K_pad, N*HW)

    # ---- glue: fold biases into the weight matrices ---------------------------
    w1_rows = jnp.concatenate(
        [w1.reshape(9 * C_in, C_mid), b1.reshape(1, C_mid),
         jnp.zeros((K_pad - K, C_mid), w1.dtype)], axis=0)          # (K_pad, C_mid)
    passthrough = jnp.zeros((1, K_pad), w1.dtype).at[0, 9 * C_in].set(1.0)
    w1_ext = jnp.concatenate(
        [w1_rows.T, passthrough,
         jnp.zeros((C_ext - C_mid - 1, K_pad), w1.dtype)], axis=0).astype(mxu_dtype)  # (C_ext, K_pad)
    w2_ext = jnp.concatenate(
        [w2.T, b2.reshape(C_mid, 1),
         jnp.zeros((C_mid, C_ext - C_mid - 1), w2.dtype)], axis=1).astype(mxu_dtype)  # (C_mid, C_ext)

    # ---- glue: LayerNorm affine params in the kernel (pre-pixel-shuffle) layout
    # kernel channel c_mid = c_out*4 + r*2 + s ; spatial index p = h*W + w.
    def to_kernel_layout(p):
        p = p.reshape(C_out, H, 2, W, 2)                            # (c, h, r, w, s)
        p = jnp.transpose(p, (0, 2, 4, 1, 3))                       # (c, r, s, h, w)
        return p.reshape(C_mid, HW).astype(jnp.float32)

    g_k = to_kernel_layout(gamma)
    bt_k = to_kernel_layout(beta)

    nb = _samples_per_step(N)
    grid = (N // nb,)
    blk = nb * HW                                                   # lane width per grid step

    out_k = pl.pallas_call(
        _sr_kernel,
        out_shape=jax.ShapeDtypeStruct((C_mid, NHW), jnp.float32),
        grid_spec=pltpu.PrefetchScalarGridSpec(
            num_scalar_prefetch=0,
            grid=grid,
            in_specs=[
                pl.BlockSpec((K_pad, blk), lambda n: (0, n)),        # xcol (lane-sliced per step)
                pl.BlockSpec((C_ext, K_pad), lambda n: (0, 0)),      # w1_ext (resident)
                pl.BlockSpec((C_mid, C_ext), lambda n: (0, 0)),      # w2_ext (resident)
                pl.BlockSpec((C_mid, HW), lambda n: (0, 0)),         # gamma (kernel layout)
                pl.BlockSpec((C_mid, HW), lambda n: (0, 0)),         # beta  (kernel layout)
            ],
            out_specs=pl.BlockSpec((C_mid, blk), lambda n: (0, n)),
        ),
        compiler_params=pltpu.CompilerParams(
            dimension_semantics=("parallel",)),
    )(xcol, w1_ext, w2_ext, g_k, bt_k)

    # ---- glue: pixel-shuffle permutation back to NCHW (pure data movement) ----
    out = out_k.reshape(C_mid, N, HW)
    out = jnp.transpose(out, (1, 0, 2))                             # (N, C_mid, HW)
    out = out.reshape(N, C_out, 2, 2, H, W)                         # (n, c, r, s, h, w)
    out = jnp.transpose(out, (0, 1, 4, 2, 5, 3))                    # (n, c, h, r, w, s)
    return out.reshape(N, C_out, 2 * H, 2 * W)


# ----------------------------------------------------------------------------
# Pure-JAX reference mirroring the PyTorch module semantics
# ----------------------------------------------------------------------------
def reference(x_nchw, w1, b1, w2, b2, gamma, beta):
    y = jax.lax.conv_general_dilated(
        x_nchw, w1, window_strides=(1, 1), padding="SAME",
        dimension_numbers=("NCHW", "HWIO", "NCHW"))
    y = y + b1[None, :, None, None]
    y = jnp.maximum(y, 0.0)
    C_mid = w2.shape[1]
    y = jax.lax.conv_general_dilated(
        y, w2.reshape(1, 1, C_mid, C_mid), window_strides=(1, 1), padding="SAME",
        dimension_numbers=("NCHW", "HWIO", "NCHW"))
    y = y + b2[None, :, None, None]
    N, Cm, H, W = y.shape
    C_out = Cm // 4
    y = y.reshape(N, C_out, 2, 2, H, W).transpose(0, 1, 4, 2, 5, 3)
    y = y.reshape(N, C_out, 2 * H, 2 * W)
    mean = y.mean(axis=(1, 2, 3), keepdims=True)
    var = ((y - mean) ** 2).mean(axis=(1, 2, 3), keepdims=True)
    return (y - mean) / jnp.sqrt(var + 1e-5) * gamma[None] + beta[None]


if __name__ == "__main__":
    key = jax.random.PRNGKey(0)
    ks = jax.random.split(key, 7)

    # Module config: input_dims=4, output_dims=4, output_resoultion=32 (= 2*H)
    N, C_in, H, W = 2, 4, 16, 16
    output_dims = 4
    C_mid = 4 * output_dims
    H_out, W_out = 2 * H, 2 * W

    x = jax.random.normal(ks[0], (N, C_in, H, W), jnp.float32)
    w1 = 0.1 * jax.random.normal(ks[1], (3, 3, C_in, C_mid), jnp.float32)   # HWIO
    b1 = 0.1 * jax.random.normal(ks[2], (C_mid,), jnp.float32)
    w2 = 0.1 * jax.random.normal(ks[3], (C_mid, C_mid), jnp.float32)        # (in, out)
    b2 = 0.1 * jax.random.normal(ks[4], (C_mid,), jnp.float32)
    gamma = 1.0 + 0.1 * jax.random.normal(ks[5], (output_dims, H_out, W_out), jnp.float32)
    beta = 0.1 * jax.random.normal(ks[6], (output_dims, H_out, W_out), jnp.float32)

    params = (w1, b1, w2, b2, gamma, beta)
    ref = reference(x, *params)

    # Default f32 MXU path: must match the f32 reference tightly.
    fwd_f32 = jax.jit(lambda xx, pp: super_resoultor(xx, pp, mxu_dtype=jnp.float32))
    out = jax.block_until_ready(fwd_f32(x, params))
    assert out.shape == (N, output_dims, H_out, W_out), out.shape
    err = float(jnp.max(jnp.abs(out - ref)))
    assert jnp.allclose(out, ref, atol=2e-3, rtol=2e-3), f"f32 max abs err {err}"

    # Optional bf16 MXU-input path (f32 accumulation / LayerNorm): looser check.
    fwd_bf16 = jax.jit(lambda xx, pp: super_resoultor(xx, pp, mxu_dtype=jnp.bfloat16))
    out_bf = jax.block_until_ready(fwd_bf16(x, params))
    err_bf = float(jnp.max(jnp.abs(out_bf - ref)))
    assert jnp.allclose(out_bf, ref, atol=5e-2, rtol=5e-2), f"bf16 max abs err {err_bf}"

    print("KERNEL_OK")
</pallas_src>

<mosaic_0001>
module attributes {stable_mosaic.version = 11 : i64} {
  func.func @_sr_kernel(%arg0: i32, %arg1: memref<40x512xf32, #tpu.memory_space<vmem>>, %arg2: memref<24x40xf32, #tpu.memory_space<vmem>>, %arg3: memref<16x24xf32, #tpu.memory_space<vmem>>, %arg4: memref<16x256xf32, #tpu.memory_space<vmem>>, %arg5: memref<16x256xf32, #tpu.memory_space<vmem>>, %arg6: memref<16x512xf32, #tpu.memory_space<vmem>>) attributes {dimension_semantics = [#tpu.dimension_semantics<parallel>], iteration_bounds = array<i64: 1>, scalar_prefetch = 0 : i64, scratch_operands = 0 : i64, tpu.core_type = #tpu.core_type<tc>, window_params = [{transform_indices = @transform_0, window_bounds = array<i64: 40, 512>}, {pipeline_mode = #tpu.pipeline_mode<synchronous>, transform_indices = @transform_1, window_bounds = array<i64: 24, 40>}, {pipeline_mode = #tpu.pipeline_mode<synchronous>, transform_indices = @transform_2, window_bounds = array<i64: 16, 24>}, {pipeline_mode = #tpu.pipeline_mode<synchronous>, transform_indices = @transform_3, window_bounds = array<i64: 16, 256>}, {pipeline_mode = #tpu.pipeline_mode<synchronous>, transform_indices = @transform_4, window_bounds = array<i64: 16, 256>}, {transform_indices = @transform_5, window_bounds = array<i64: 16, 512>}]} {
    %c0 = arith.constant 0 : index
    %c0_0 = arith.constant 0 : index
    %0 = vector.load %arg2[%c0, %c0_0] : memref<24x40xf32, #tpu.memory_space<vmem>>, vector<24x40xf32>
    %c0_1 = arith.constant 0 : index
    %c0_2 = arith.constant 0 : index
    %1 = vector.load %arg3[%c0_1, %c0_2] : memref<16x24xf32, #tpu.memory_space<vmem>>, vector<16x24xf32>
    %c0_3 = arith.constant 0 : index
    %c0_4 = arith.constant 0 : index
    %2 = vector.load %arg4[%c0_3, %c0_4] : memref<16x256xf32, #tpu.memory_space<vmem>>, vector<16x256xf32>
    %c0_5 = arith.constant 0 : index
    %c0_6 = arith.constant 0 : index
    %3 = vector.load %arg5[%c0_5, %c0_6] : memref<16x256xf32, #tpu.memory_space<vmem>>, vector<16x256xf32>
    %c0_7 = arith.constant 0 : index
    %c0_8 = arith.constant 0 : index
    %4 = vector.load %arg1[%c0_7, %c0_8] : memref<40x512xf32, #tpu.memory_space<vmem>>, vector<40x512xf32>
    %cst = arith.constant dense<0.000000e+00> : vector<24x512xf32>
    %5 = tpu.matmul %0, %4, %cst {dimension_numbers = #tpu.dot_dimension_numbers<[1], [0], [0], [1], [0, 0, 1, 1], [], []>} : vector<24x40xf32>, vector<40x512xf32>, vector<24x512xf32> -> vector<24x512xf32>
    %cst_9 = arith.constant 0.000000e+00 : f32
    %6 = vector.broadcast %cst_9 : f32 to vector<24x512xf32>
    %7 = arith.maximumf %5, %6 : vector<24x512xf32>
    %cst_10 = arith.constant dense<0.000000e+00> : vector<16x512xf32>
    %8 = tpu.matmul %1, %7, %cst_10 {dimension_numbers = #tpu.dot_dimension_numbers<[1], [0], [0], [1], [0, 0, 1, 1], [], []>} : vector<16x24xf32>, vector<24x512xf32>, vector<16x512xf32> -> vector<16x512xf32>
    %9 = vector.extract_strided_slice %8 {offsets = [0, 0], sizes = [16, 256], strides = [1, 1]} : vector<16x512xf32> to vector<16x256xf32>
    %10 = vector.shape_cast %9 : vector<16x256xf32> to vector<1x16x256xf32>
    %cst_11 = arith.constant dense<0.000000e+00> : vector<1xf32>
    %11 = vector.multi_reduction <add>, %10, %cst_11 [1, 2] : vector<1x16x256xf32> to vector<1xf32>
    %12 = vector.shape_cast %11 : vector<1xf32> to vector<1x1x1xf32>
    %13 = vector.extract %12[0, 0, 0] : f32 from vector<1x1x1xf32>
    %cst_12 = arith.constant 2.44140625E-4 : f32
    %14 = arith.mulf %13, %cst_12 : f32
    %15 = vector.broadcast %14 : f32 to vector<16x256xf32>
    %16 = arith.subf %9, %15 : vector<16x256xf32>
    %17 = arith.mulf %16, %16 : vector<16x256xf32>
    %18 = vector.shape_cast %17 : vector<16x256xf32> to vector<1x16x256xf32>
    %cst_13 = arith.constant dense<0.000000e+00> : vector<1xf32>
    %19 = vector.multi_reduction <add>, %18, %cst_13 [1, 2] : vector<1x16x256xf32> to vector<1xf32>
    %20 = vector.shape_cast %19 : vector<1xf32> to vector<1x1x1xf32>
    %21 = vector.extract %20[0, 0, 0] : f32 from vector<1x1x1xf32>
    %cst_14 = arith.constant 2.44140625E-4 : f32
    %22 = arith.mulf %21, %cst_14 : f32
    %cst_15 = arith.constant 9.99999974E-6 : f32
    %23 = arith.addf %22, %cst_15 : f32
    %24 = math.rsqrt %23 : f32
    %25 = vector.broadcast %24 : f32 to vector<16x256xf32>
    %26 = arith.mulf %16, %25 : vector<16x256xf32>
    %27 = arith.mulf %26, %2 : vector<16x256xf32>
    %28 = arith.addf %27, %3 : vector<16x256xf32>
    %c0_16 = arith.constant 0 : index
    %c0_17 = arith.constant 0 : index
    %29 = vector.load %arg6[%c0_16, %c0_17] : memref<16x512xf32, #tpu.memory_space<vmem>>, vector<16x256xf32>
    tpu.vector_store %arg6[%c0_16, %c0_17], %28 {strides = array<i32>} : memref<16x512xf32, #tpu.memory_space<vmem>>, vector<16x256xf32>,
    %30 = vector.extract_strided_slice %8 {offsets = [0, 256], sizes = [16, 256], strides = [1, 1]} : vector<16x512xf32> to vector<16x256xf32>
    %31 = vector.shape_cast %30 : vector<16x256xf32> to vector<1x16x256xf32>
    %cst_18 = arith.constant dense<0.000000e+00> : vector<1xf32>
    %32 = vector.multi_reduction <add>, %31, %cst_18 [1, 2] : vector<1x16x256xf32> to vector<1xf32>
    %33 = vector.shape_cast %32 : vector<1xf32> to vector<1x1x1xf32>
    %34 = vector.extract %33[0, 0, 0] : f32 from vector<1x1x1xf32>
    %cst_19 = arith.constant 2.44140625E-4 : f32
    %35 = arith.mulf %34, %cst_19 : f32
    %36 = vector.broadcast %35 : f32 to vector<16x256xf32>
    %37 = arith.subf %30, %36 : vector<16x256xf32>
    %38 = arith.mulf %37, %37 : vector<16x256xf32>
    %39 = vector.shape_cast %38 : vector<16x256xf32> to vector<1x16x256xf32>
    %cst_20 = arith.constant dense<0.000000e+00> : vector<1xf32>
    %40 = vector.multi_reduction <add>, %39, %cst_20 [1, 2] : vector<1x16x256xf32> to vector<1xf32>
    %41 = vector.shape_cast %40 : vector<1xf32> to vector<1x1x1xf32>
    %42 = vector.extract %41[0, 0, 0] : f32 from vector<1x1x1xf32>
    %cst_21 = arith.constant 2.44140625E-4 : f32
    %43 = arith.mulf %42, %cst_21 : f32
    %cst_22 = arith.constant 9.99999974E-6 : f32
    %44 = arith.addf %43, %cst_22 : f32
    %45 = math.rsqrt %44 : f32
    %46 = vector.broadcast %45 : f32 to vector<16x256xf32>
    %47 = arith.mulf %37, %46 : vector<16x256xf32>
    %48 = arith.mulf %47, %2 : vector<16x256xf32>
    %49 = arith.addf %48, %3 : vector<16x256xf32>
    %c0_23 = arith.constant 0 : index
    %c256 = arith.constant 256 : index
    %50 = vector.load %arg6[%c0_23, %c256] : memref<16x512xf32, #tpu.memory_space<vmem>>, vector<16x256xf32>
    tpu.vector_store %arg6[%c0_23, %c256], %49 {strides = array<i32>} : memref<16x512xf32, #tpu.memory_space<vmem>>, vector<16x256xf32>,
    return
  }
  func.func @transform_0(%arg0: i32) -> (i32, i32) {
    %c0_i32 = arith.constant 0 : i32
    %c0_i32_0 = arith.constant 0 : i32
    return %c0_i32, %arg0 : i32, i32
  }
  func.func @transform_1(%arg0: i32) -> (i32, i32) {
    %c0_i32 = arith.constant 0 : i32
    %c0_i32_0 = arith.constant 0 : i32
    %c0_i32_1 = arith.constant 0 : i32
    return %c0_i32, %c0_i32_0 : i32, i32
  }
  func.func @transform_2(%arg0: i32) -> (i32, i32) {
    %c0_i32 = arith.constant 0 : i32
    %c0_i32_0 = arith.constant 0 : i32
    %c0_i32_1 = arith.constant 0 : i32
    return %c0_i32, %c0_i32_0 : i32, i32
  }
  func.func @transform_3(%arg0: i32) -> (i32, i32) {
    %c0_i32 = arith.constant 0 : i32
    %c0_i32_0 = arith.constant 0 : i32
    %c0_i32_1 = arith.constant 0 : i32
    return %c0_i32, %c0_i32_0 : i32, i32
  }
  func.func @transform_4(%arg0: i32) -> (i32, i32) {
    %c0_i32 = arith.constant 0 : i32
    %c0_i32_0 = arith.constant 0 : i32
    %c0_i32_1 = arith.constant 0 : i32
    return %c0_i32, %c0_i32_0 : i32, i32
  }
  func.func @transform_5(%arg0: i32) -> (i32, i32) {
    %c0_i32 = arith.constant 0 : i32
    %c0_i32_0 = arith.constant 0 : i32
    return %c0_i32, %arg0 : i32, i32
  }
}

</mosaic_0001>

<bundles_post_ra>
// kernel: _lambda_.1
= control target key start
LH: loop header
LB: loop body
LE: loop exit
PB: predicated region body
PF: predicated region fallthrough
CT: control target
= control target key end

     0   :  { %v569_v3 = vmov 0.0   ;;  %vm53_vm0 = vcmask 326656   ;;  %vm241_vm1 = vcmask 195584   ;;  %s763_s0 = inlined_call_operand.vmem [shape: f32[40,512], index: 0, kind: input, shape index: {}]   ;;  %s764_s1 = inlined_call_operand.vmem [shape: f32[24,40], index: 1, kind: input, shape index: {}]   ;;  %s765_s2 = inlined_call_operand.vmem [shape: f32[16,24], index: 2, kind: input, shape index: {}]   ;;  %s766_s3 = inlined_call_operand.vmem [shape: f32[16,256], index: 3, kind: input, shape index: {}]   ;;  %s767_s4 = inlined_call_operand.vmem [shape: f32[16,256], index: 4, kind: input, shape index: {}]   ;;  %s768_s5 = inlined_call_operand.vmem [shape: f32[16,512], index: 5, kind: output, shape index: {}]  }
   0x1   :  { %v34_v0 = vld [vmem:[%s763_s0 + $0x8] sm:$0xff]  ;;  %v33_v2 = vld [vmem:[%s763_s0] sm:$0xff]  ;;  %127 = vmatprep.mubr.f32.mxu0 %v569_v3  ;;  %210 = vmatprep.mubr.f32.mxu1 %v569_v3  ;;  %v22_v17 = vld [vmem:[%s764_s1 + $0x10] sm:$0xff] }
   0x2   :  { %v38_v1 = vld [vmem:[%s763_s0 + $0x28] sm:$0xff]  ;;  %v37_v5 = vld [vmem:[%s763_s0 + $0x20] sm:$0xff]  ;;  %v36_v18 = vld [vmem:[%s763_s0 + $0x18] sm:$0xff] }
   0x3   :  { %v528_v4 = vpack.c.bf16 %v38_v1, %v34_v0  ;;  %v42_v6 = vld [vmem:[%s763_s0 + $0x48] sm:$0xff]  ;;  %v530_v8 = vpack.c.bf16 %v37_v5, %v33_v2  ;;  %v41_v10 = vld [vmem:[%s763_s0 + $0x40] sm:$0xff]  ;;  %v40_v19 = vld [vmem:[%s763_s0 + $0x38] sm:$0xff] }
   0x4   :  { %v46_v7 = vld [vmem:[%s763_s0 + $0x68] sm:$0xff]  ;;  %v45_v11 = vld [vmem:[%s763_s0 + $0x60] sm:$0xff]  ;;  %v35_v20 = vld [vmem:[%s763_s0 + $0x10] sm:$0xff]  ;;  %v536_v21 = vpack.c.bf16 %v40_v19, %v36_v18 }
   0x5   :  { %v532_v9 = vpack.c.bf16 %v46_v7, %v42_v6  ;;  %529 = vmatprep.subr.bf16.mxu0 %v528_v4  ;;  %v534_v12 = vpack.c.bf16 %v45_v11, %v41_v10  ;;  %v50_v13 = vld [vmem:[%s763_s0 + $0x88] sm:$0xff]  ;;  %v49_v14 = vld [vmem:[%s763_s0 + $0x80] sm:$0xff]  ;;  %v39_v22 = vld [vmem:[%s763_s0 + $0x30] sm:$0xff] }
   0x6   :  { %531 = vmatpush1.bf16.msra.mxu0 %v530_v8  ;;  %v20_v15 = vld [vmem:[%s764_s1] sm:$0xff]  ;;  %v21_v16 = vld [vmem:[%s764_s1 + $0x8] sm:$0xff]  ;;  %v44_v23 = vld [vmem:[%s763_s0 + $0x58] sm:$0xff]  ;;  %v538_v25 = vpack.c.bf16 %v39_v22, %v35_v20  ;;  %537 = vmatprep.subr.bf16.mxu1 %v536_v21 }
   0x7   :  { %533 = vmatprep.subr.bf16.mxu0 %v532_v9  ;;  %v48_v24 = vld [vmem:[%s763_s0 + $0x78] sm:$0xff]  ;;  %v43_v27 = vld [vmem:[%s763_s0 + $0x50] sm:$0xff]  ;;  %v23_v46 = vld [vmem:[%s765_s2] sm:$0xff] }
   0x8   :  { %v540_v26 = vpack.c.bf16 %v48_v24, %v44_v23  ;;  %v47_v28 = vld [vmem:[%s763_s0 + $0x70] sm:$0xff]  ;;  %539 = vmatpush1.bf16.msra.mxu1 %v538_v25  ;;  %v52_v30 = vld [vmem:[%s763_s0 + $0x98] sm:$0xff]  ;;  %v24_v47 = vld [vmem:[%s765_s2 + $0x8] sm:$0xff] }
   0x9   :  { %v542_v29 = vpack.c.bf16 %v47_v28, %v43_v27  ;;  %v51_v31 = vld [vmem:[%s763_s0 + $0x90] sm:$0xff] }
   0xa   :  { %535 = vmatpush1.bf16.msra.mxu0 %v534_v12  ;;  %541 = vmatprep.subr.bf16.mxu1 %v540_v26 }
   0xb   :  { %71 = vmatprep.subr.mxu0 %v50_v13 }
   0xc   :  { %543 = vmatpush1.bf16.msra.mxu1 %v542_v29 }
   0xd   :  { %154 = vmatprep.subr.mxu1 %v52_v30 }
   0xe   :  { %72 = vmatpush1.msra.mxu0 %v49_v14 }
   0xf   :  { %518 = vmatmul.mubr.msk.f32.vlgmr.msra.gmra.mrb[0].mxu0 %vm53_vm0, %v20_v15 }
  0x10   :  { %133 = vmatprep.mubr.f32.mxu0 %v569_v3  ;;  %155 = vmatpush1.msra.mxu1 %v51_v31 }
  0x11   :  { %521 = vmatmul.mubr.msk.f32.vlgmr.msra.gmra.mrb[0].mxu1 %vm53_vm0, %v20_v15 }
  0x12   :  { %216 = vmatprep.mubr.f32.mxu1 %v569_v3 }
  0x13   :  { %519 = vmatmul.mubr.msk.f32.gmra.mrb[2].mxu0 %vm53_vm0, %v21_v16 }
  0x14   :  { %139 = vmatprep.mubr.f32.mxu0 %v569_v3 }
  0x15   :  { %522 = vmatmul.mubr.msk.f32.gmra.mrb[2].mxu1 %vm53_vm0, %v21_v16 }
  0x16   :  { %222 = vmatprep.mubr.f32.mxu1 %v569_v3 }
  0x17   :  { %520 = vmatmul.mubr.msk.f32.gmra.mrb[4].mxu0 %vm53_vm0, %v22_v17 }
  0x18   :  { %312 = vmatprep.mubr.f32.mxu0 %v569_v3 }
  0x19   :  { %523 = vmatmul.mubr.msk.f32.gmra.mrb[4].mxu1 %vm53_vm0, %v22_v17 }
  0x1a   :  { %389 = vmatprep.mubr.f32.mxu1 %v569_v3 }
  0xe2   :  { %v129_v32 = vpop.f32.mrb[0].mxu0 }
  0xe3   :  { %v131_v33 = vpop.f32.mrb[1].mxu0  ;;  %v229_v35 = vmax.f32 %v129_v32, 0.0 }
  0xe4   :  { %v230_v38 = vmax.f32 %v131_v33, 0.0  ;;  %v212_v48 = vpop.f32.mrb[0].mxu1 }
  0xe5   :  { %v214_v49 = vpop.f32.mrb[1].mxu1  ;;  %v231_v50 = vmax.f32 %v212_v48, 0.0  ;;  %v26_v48 = vld [vmem:[%s766_s3 + $0x8] sm:$0xff] }
  0xe6   :  { %v135_v34 = vpop.f32.mrb[2].mxu0  ;;  %v232_v51 = vmax.f32 %v214_v49, 0.0  ;;  %v27_v49 = vld [vmem:[%s766_s3 + $0x10] sm:$0xff] }
  0xe7   :  { %v233_v36 = vmax.f32 %v135_v34, 0.0  ;;  %v137_v37 = vpop.f32.mrb[3].mxu0 }
  0xe8   :  { %v234_v39 = vmax.f32 %v137_v37, 0.0  ;;  %v218_v52 = vpop.f32.mrb[2].mxu1 }
  0xe9   :  { %v546_v40 = vpack.c.bf16 %v233_v36, %v229_v35  ;;  %v235_v53 = vmax.f32 %v218_v52, 0.0  ;;  %v220_v54 = vpop.f32.mrb[3].mxu1  ;;  %v29_v52 = vld [vmem:[%s767_s4] sm:$0xff] }
  0xea   :  { %v544_v41 = vpack.c.bf16 %v234_v39, %v230_v38  ;;  %v141_v42 = vpop.f32.mrb[4].mxu0  ;;  %v236_v55 = vmax.f32 %v220_v54, 0.0 }
  0xeb   :  { %v143_v43 = vpop.f32.mrb[5].mxu0  ;;  %v237_v45 = vmax.f32 %v141_v42, 0.0  ;;  %v550_v56 = vpack.c.bf16 %v235_v53, %v231_v50  ;;  %v28_v50 = vld [vmem:[%s766_s3 + $0x18] sm:$0xff] }
  0xec   :  { %545 = vmatprep.subr.bf16.mxu0 %v544_v41  ;;  %v238_v44 = vmax.f32 %v143_v43, 0.0  ;;  %v548_v57 = vpack.c.bf16 %v236_v55, %v232_v51  ;;  %v224_v58 = vpop.f32.mrb[4].mxu1 }
  0xed   :  { %547 = vmatpush1.bf16.msra.mxu0 %v546_v40  ;;  %v226_v59 = vpop.f32.mrb[5].mxu1  ;;  %v239_v61 = vmax.f32 %v224_v58, 0.0  ;;  %v31_v58 = vld [vmem:[%s767_s4 + $0x10] sm:$0xff] }
  0xee   :  { %252 = vmatprep.subr.mxu0 %v238_v44  ;;  %549 = vmatprep.subr.bf16.mxu1 %v548_v57  ;;  %v240_v60 = vmax.f32 %v226_v59, 0.0  ;;  %v30_v57 = vld [vmem:[%s767_s4 + $0x8] sm:$0xff]  ;;  %v32_v59 = vld [vmem:[%s767_s4 + $0x18] sm:$0xff] }
  0xef   :  { %551 = vmatpush1.bf16.msra.mxu1 %v550_v56 }
  0xf0   :  { %329 = vmatprep.subr.mxu1 %v240_v60 }
  0xf1   :  { %253 = vmatpush1.msra.mxu0 %v237_v45 }
  0xf2   :  { %524 = vmatmul.mubr.msk.f32.vlgmr.msra.gmra.mrb[6].mxu0 %vm241_vm1, %v23_v46 }
  0xf3   :  { %318 = vmatprep.mubr.f32.mxu0 %v569_v3  ;;  %330 = vmatpush1.msra.mxu1 %v239_v61 }
  0xf4   :  { %526 = vmatmul.mubr.msk.f32.vlgmr.msra.gmra.mrb[6].mxu1 %vm241_vm1, %v23_v46 }
  0xf5   :  { %395 = vmatprep.mubr.f32.mxu1 %v569_v3 }
  0xf6   :  { %525 = vmatmul.mubr.msk.f32.gmra.mrb[8].mxu0 %vm241_vm1, %v24_v47 }
  0xf8   :  { %527 = vmatmul.mubr.msk.f32.gmra.mrb[8].mxu1 %vm241_vm1, %v24_v47  ;;  %v710_v47 = vld [vmem:[%s766_s3] sm:$0xff] }
 0x1c5   :  { %v314_v62 = vpop.f32.mrb[6].mxu0 }
 0x1c6   :  { %v316_v63 = vpop.f32.mrb[7].mxu0 }
 0x1c7   :  { %v402_v0 = vadd.f32 %v316_v63, %v314_v62  ;;  %v695_v6 = vpop.f32.mrb[6].mxu1 }
 0x1c8   :  { %v697_v7 = vpop.f32.mrb[7].mxu1 }
 0x1c9   :  { %v320_v1 = vpop.f32.mrb[8].mxu0  ;;  %v458_v8 = vadd.f32 %v697_v7, %v695_v6 }
 0x1ca   :  { %v403_v2 = vadd.f32 %v402_v0, %v320_v1  ;;  %v322_v4 = vpop.f32.mrb[9].mxu0 }
 0x1cb   :  { %v701_v9 = vpop.f32.mrb[8].mxu1 }
 0x1cc   :  { %v404_v5 = vadd.f32 %v403_v2, %v322_v4  ;;  %v459_v3 = vadd.f32 %v458_v8, %v701_v9  ;;  %v704_v10 = vpop.f32.mrb[9].mxu1 }
 0x1ce   :  { %405 = vadd.xlane.f32.xlu0 %v404_v5  ;;  %v460_v11 = vadd.f32 %v459_v3, %v704_v10 }
 0x1d0   :  { %461 = vadd.xlane.f32.xlu1 %v460_v11 }
 0x25b   :  { %v406_v12 = vpop.xlane.xlu0 %405 }
 0x25c   :  { %v407_v13 = vrot.slane %v406_v12, 4 }
 0x25d   :  { %v462_v38 = vpop.xlane.xlu1 %461 }
 0x25e   :  { %v408_v14 = vadd.f32 %v407_v13, %v406_v12  ;;  %v463_v39 = vrot.slane %v462_v38, 4 }
 0x260   :  { %v409_v15 = vrot.slane %v408_v14, 2  ;;  %v464_v40 = vadd.f32 %v463_v39, %v462_v38 }
 0x262   :  { %v410_v16 = vadd.f32 %v409_v15, %v408_v14  ;;  %v465_v41 = vrot.slane %v464_v40, 2 }
 0x264   :  { %v411_v17 = vrot.slane %v410_v16, 1  ;;  %v466_v43 = vadd.f32 %v465_v41, %v464_v40 }
 0x266   :  { %v412_v18 = vadd.f32 %v411_v17, %v410_v16  ;;  %v467_v44 = vrot.slane %v466_v43, 1 }
 0x268   :  { %552 = vpush %v412_v18  ;;  %v468_v46 = vadd.f32 %v467_v44, %v466_v43 }
 0x299   :  { %s553_s2 = spop %552 }
 0x29a   :  { %s414_s16 = smul.f32 0.00024414063, %s553_s2 }
 0x29c   :  { %v415_v19 = vstv %s414_s16 }
 0x29d   :  { %v416_v20 = vsub.f32 %v314_v62, %v415_v19  ;;  %v417_v21 = vsub.f32 %v316_v63, %v415_v19  ;;  %v418_v22 = vsub.f32 %v320_v1, %v415_v19  ;;  %v419_v23 = vsub.f32 %v322_v4, %v415_v19 }
 0x29f   :  { %v420_v24 = vmul.f32 %v416_v20, %v416_v20  ;;  %v421_v25 = vmul.f32 %v417_v21, %v417_v21  ;;  %v422_v26 = vmul.f32 %v418_v22, %v418_v22  ;;  %v423_v28 = vmul.f32 %v419_v23, %v419_v23 }
 0x2a1   :  { %v424_v27 = vadd.f32 %v421_v25, %v420_v24 }
 0x2a3   :  { %v425_v29 = vadd.f32 %v424_v27, %v422_v26 }
 0x2a5   :  { %v426_v30 = vadd.f32 %v425_v29, %v423_v28 }
 0x2a7   :  { %427 = vadd.xlane.f32.xlu0 %v426_v30 }
 0x334   :  { %v428_v31 = vpop.xlane.xlu0 %427 }
 0x335   :  { %v429_v32 = vrot.slane %v428_v31, 4 }
 0x337   :  { %v430_v33 = vadd.f32 %v429_v32, %v428_v31 }
 0x339   :  { %v431_v34 = vrot.slane %v430_v33, 2 }
 0x33b   :  { %v432_v35 = vadd.f32 %v431_v34, %v430_v33 }
 0x33d   :  { %v433_v36 = vrot.slane %v432_v35, 1 }
 0x33f   :  { %v434_v37 = vadd.f32 %v433_v36, %v432_v35 }
 0x341   :  { %554 = vpush %v434_v37 }
 0x372   :  { %s555_s17 = spop %554 }
 0x373   :  { %s436_s18 = smul.f32 0.00024414063, %s555_s17 }
 0x375   :  { %s437_s19 = sadd.f32 1e-05, %s436_s18 }
 0x377   :  { %v438_v42 = vstv %s437_s19 }
 0x378   :  { %565 = vrsqrt.f32 %v438_v42 }
 0x382   :  { %v566_v45 = vpop.eup %565 }
 0x383   :  { %556 = vpush %v566_v45 }
 0x384   :  { %558 = vpush %v468_v46 }
 0x3b4   :  { %s557_s22 = spop %556 }
 0x3b5   :  { %v441_v51 = vstv %s557_s22  ;;  %s559_s28 = spop %558 }
 0x3b6   :  { %v442_v53 = vmul.f32 %v441_v51, %v416_v20  ;;  %v443_v54 = vmul.f32 %v441_v51, %v417_v21  ;;  %v444_v55 = vmul.f32 %v441_v51, %v418_v22  ;;  %v445_v56 = vmul.f32 %v441_v51, %v419_v23  ;;  %s470_s6 = smul.f32 0.00024414063, %s559_s28 }
 0x3b8   :  { %v446_v60 = vmul.f32 %v442_v53, %v710_v47  ;;  %v447_v61 = vmul.f32 %v443_v54, %v26_v48  ;;  %v448_v62 = vmul.f32 %v444_v55, %v27_v49  ;;  %v449_v63 = vmul.f32 %v445_v56, %v28_v50 }
 0x3b9   :  { %v471_v0 = vstv %s470_s6 }
 0x3ba   :  { %v450_v1 = vadd.f32 %v446_v60, %v29_v52  ;;  %v451_v2 = vadd.f32 %v447_v61, %v30_v57  ;;  %v452_v4 = vadd.f32 %v448_v62, %v31_v58  ;;  %v453_v5 = vadd.f32 %v449_v63, %v32_v59 }
 0x3bb   :  { %v472_v8 = vsub.f32 %v695_v6, %v471_v0  ;;  %v473_v3 = vsub.f32 %v697_v7, %v471_v0  ;;  %v474_v11 = vsub.f32 %v701_v9, %v471_v0  ;;  %v475_v6 = vsub.f32 %v704_v10, %v471_v0 }
 0x3bc   :  { %454 = vst [vmem:[%s768_s5] sm:$0xff] %v450_v1  ;;  %455 = vst [vmem:[%s768_s5 + $0x8] sm:$0xff] %v451_v2 }
 0x3bd   :  { %456 = vst [vmem:[%s768_s5 + $0x20] sm:$0xff] %v452_v4  ;;  %457 = vst [vmem:[%s768_s5 + $0x28] sm:$0xff] %v453_v5  ;;  %v476_v7 = vmul.f32 %v472_v8, %v472_v8  ;;  %v477_v9 = vmul.f32 %v473_v3, %v473_v3  ;;  %v478_v12 = vmul.f32 %v474_v11, %v474_v11 }
 0x3be   :  { %v479_v14 = vmul.f32 %v475_v6, %v475_v6 }
 0x3bf   :  { %v480_v13 = vadd.f32 %v477_v9, %v476_v7 }
 0x3c1   :  { %v481_v15 = vadd.f32 %v480_v13, %v478_v12 }
 0x3c3   :  { %v482_v16 = vadd.f32 %v481_v15, %v479_v14 }
 0x3c5   :  { %483 = vadd.xlane.f32.xlu1 %v482_v16 }
 0x452   :  { %v484_v17 = vpop.xlane.xlu1 %483 }
 0x453   :  { %v485_v18 = vrot.slane %v484_v17, 4 }
 0x455   :  { %v486_v19 = vadd.f32 %v485_v18, %v484_v17 }
 0x457   :  { %v487_v20 = vrot.slane %v486_v19, 2 }
 0x459   :  { %v488_v21 = vadd.f32 %v487_v20, %v486_v19 }
 0x45b   :  { %v489_v22 = vrot.slane %v488_v21, 1 }
 0x45d   :  { %v490_v23 = vadd.f32 %v489_v22, %v488_v21 }
 0x45f   :  { %560 = vpush %v490_v23 }
 0x490   :  { %s561_s17 = spop %560 }
 0x491   :  { %s492_s18 = smul.f32 0.00024414063, %s561_s17 }
 0x493   :  { %s493_s19 = sadd.f32 1e-05, %s492_s18 }
 0x495   :  { %v494_v10 = vstv %s493_s19 }
 0x496   :  { %567 = vrsqrt.f32 %v494_v10 }
 0x4a0   :  { %v568_v24 = vpop.eup %567 }
 0x4a1   :  { %562 = vpush %v568_v24 }
 0x4d2   :  { %s563_s20 = spop %562 }
 0x4d3   :  { %v497_v25 = vstv %s563_s20 }
 0x4d4   :  { %v498_v26 = vmul.f32 %v497_v25, %v472_v8  ;;  %v499_v27 = vmul.f32 %v497_v25, %v473_v3  ;;  %v500_v28 = vmul.f32 %v497_v25, %v474_v11  ;;  %v501_v29 = vmul.f32 %v497_v25, %v475_v6 }
 0x4d6   :  { %v502_v30 = vmul.f32 %v498_v26, %v710_v47  ;;  %v503_v31 = vmul.f32 %v499_v27, %v26_v48  ;;  %v504_v32 = vmul.f32 %v500_v28, %v27_v49  ;;  %v505_v33 = vmul.f32 %v501_v29, %v28_v50 }
 0x4d8   :  { %v506_v34 = vadd.f32 %v502_v30, %v29_v52  ;;  %v507_v35 = vadd.f32 %v503_v31, %v30_v57  ;;  %v508_v36 = vadd.f32 %v504_v32, %v31_v58  ;;  %v509_v37 = vadd.f32 %v505_v33, %v32_v59 }
 0x4da   :  { %510 = vst [vmem:[%s768_s5 + $0x10] sm:$0xff] %v506_v34  ;;  %511 = vst [vmem:[%s768_s5 + $0x18] sm:$0xff] %v507_v35 }
 0x4db   :  { %512 = vst [vmem:[%s768_s5 + $0x30] sm:$0xff] %v508_v36  ;;  %513 = vst [vmem:[%s768_s5 + $0x38] sm:$0xff] %v509_v37 }

</bundles_post_ra>
